<compile_context>
chip_gen: v6e
topology: v6e:2x2x1
jax: 0.10.0
libtpu: 0.0.40
codegen_flags: <defaults>
</compile_context>

<pallas_src>
import functools

import jax
import jax.numpy as jnp
from jax import lax
from jax.experimental import pallas as pl
from jax.experimental.pallas import tpu as pltpu


def _round_up(v, m):
    return (v + m - 1) // m * m


def _tcn_kernel(x_pad_ref, cemb_ref, mask_ref, wbig_ref, w2_ref,
                b1_ref, b2_ref, bres_ref, out_ref, slab1, slab2,
                *, C_in, C_out, K, D, P, L, L_lane):
    """One batch element: [conv1 + residual] matmul -> ReLU -> conv2 matmul
    (+ folded embedding term) -> ReLU -> add residual."""
    x_pad = x_pad_ref[0]                                   # (C_in, L_lane + 2P)

    # ---- im2col slab for conv1; the last block is the center slice used by the
    # ---- fused residual 1x1 conv (always correct, no center-tap alignment needed)
    for j in range(K):
        slab1[j * C_in:(j + 1) * C_in, :] = x_pad[:, j * D:j * D + L_lane]
    slab1[K * C_in:(K + 1) * C_in, :] = x_pad[:, P:P + L_lane]

    # single deep matmul: rows [:C_out] = BN-scaled conv1, rows [C_out:] = residual
    big = jnp.dot(wbig_ref[...], slab1[...], preferred_element_type=jnp.float32)
    out1 = jnp.maximum(big[:C_out] + b1_ref[...], 0.0)     # BN1 folded into W/bias
    res = big[C_out:] + bres_ref[...]

    # ---- im2col slab for conv2: zeros are written ONLY on the halo columns,
    # ---- the interior is a shifted copy of out1 (no full-buffer re-zeroing).
    for j in range(K):
        off = j * D - P                                    # static Python ints
        t_lo = max(0, -off)
        t_hi = min(L_lane, L - off)
        r = j * C_out
        if t_lo > 0:
            slab2[r:r + C_out, :t_lo] = jnp.zeros((C_out, t_lo), slab2.dtype)
        if t_hi < L_lane:
            slab2[r:r + C_out, t_hi:] = jnp.zeros((C_out, L_lane - t_hi), slab2.dtype)
        slab2[r:r + C_out, t_lo:t_hi] = \
            out1[:, t_lo + off:t_hi + off].astype(slab2.dtype)

    pre2 = jnp.dot(w2_ref[...], slab2[...], preferred_element_type=jnp.float32)

    # embedding contribution of the eliminated concat: per-tap constants x 0/1
    # edge mask (masks out taps that would have read conv2's zero padding)
    emb_c = jnp.dot(cemb_ref[0], mask_ref[...], preferred_element_type=jnp.float32)

    out2 = jnp.maximum(pre2 + emb_c + b2_ref[...], 0.0)    # BN2 folded
    out_ref[0] = (out2 + res).astype(out_ref.dtype)


def tcn_block(x, emb, params, *, kernel_size, dilation):
    """x: (N, C_in, L) float32, emb: (N, E) float32 -> (N, C_out, L) float32."""
    N, C_in, L = x.shape
    E = emb.shape[1]
    C_out = params["w1"].shape[0]
    K, D = kernel_size, dilation
    assert (K - 1) * D % 2 == 0, (
        "TCNBlock 'same' padding requires (kernel_size-1)*dilation to be even")
    P = (K - 1) * D // 2
    L_lane = _round_up(L, 128)           # lane-dense tiles / unmasked output stores
    Lp = L_lane + 2 * P
    eps = 1e-5
    f32 = jnp.float32

    # bf16 matmul inputs (f32 accumulation) only when contractions are deep enough
    mm_dtype = jnp.bfloat16 if min((K + 1) * C_in, K * C_out) >= 128 else f32

    # ---- fold BatchNorm (eval mode) scale into conv weights, shift into bias ----
    s1 = params["gamma1"] / jnp.sqrt(params["var1"] + eps)
    b1 = params["beta1"] + (params["b1"] - params["mean1"]) * s1
    s2 = params["gamma2"] / jnp.sqrt(params["var2"] + eps)
    b2 = params["beta2"] + (params["b2"] - params["mean2"]) * s2
    w1s = params["w1"].astype(f32) * s1[:, None, None]            # (C_out, C_in, K)
    w2s = params["w2"].astype(f32) * s2[:, None, None]            # (C_out, C_out+E, K)
    w2_main, w2_emb = w2s[:, :C_out, :], w2s[:, C_out:, :]

    # ---- im2col weight packing; residual 1x1 rides as extra rows of conv1 ----
    w1_cols = jnp.transpose(w1s, (0, 2, 1)).reshape(C_out, K * C_in)
    w_top = jnp.concatenate([w1_cols, jnp.zeros((C_out, C_in), f32)], axis=1)
    w_bot = jnp.concatenate([jnp.zeros((C_out, K * C_in), f32),
                             params["wres"].astype(f32)], axis=1)
    wbig = jnp.concatenate([w_top, w_bot], axis=0).astype(mm_dtype)     # (2C_out,(K+1)C_in)
    w2_cols = (jnp.transpose(w2_main, (0, 2, 1))
               .reshape(C_out, K * C_out).astype(mm_dtype))             # (C_out, K*C_out)

    # ---- embedding: concat eliminated -> per-(batch, tap) constants + edge mask ----
    Kp = _round_up(K, 8)
    cemb = jnp.einsum("oej,ne->noj", w2_emb, emb.astype(f32))           # (N, C_out, K)
    cemb = jnp.pad(cemb, ((0, 0), (0, 0), (0, Kp - K)))
    t_idx = jnp.arange(L_lane)
    mask = jnp.stack([((t_idx + j * D - P >= 0) & (t_idx + j * D - P < L))
                      for j in range(K)], axis=0).astype(f32)           # (K, L_lane)
    mask = jnp.pad(mask, ((0, Kp - K), (0, 0)))

    col = lambda v: v.reshape(C_out, 1).astype(f32)

    # pad time axis: lane padding up to L_lane plus the P-element conv halo
    x_pad = jnp.pad(x.astype(mm_dtype), ((0, 0), (0, 0), (P, P + (L_lane - L))))

    kern = functools.partial(_tcn_kernel, C_in=C_in, C_out=C_out, K=K, D=D,
                             P=P, L=L, L_lane=L_lane)

    def full(shape):
        return pl.BlockSpec(shape, lambda n, _r=len(shape): (0,) * _r)

    itemsize = jnp.dtype(mm_dtype).itemsize
    est = (2 * C_in * Lp * itemsize                                 # x block (dbl-buffered)
           + 2 * C_out * L_lane * 4                                 # out block
           + ((K + 1) * C_in + K * C_out) * L_lane * itemsize       # im2col slabs
           + 8 * C_out * L_lane * 4                                 # f32 temporaries
           + 4 * (Kp * L_lane + C_out * Kp + 3 * C_out)             # mask/cemb/biases
           + 2 * (2 * C_out * (K + 1) * C_in + C_out * K * C_out) * itemsize)
    # TODO(synk): tile the time axis (with a P halo) for very long L so blocks fit
    # v7x's 64 MiB VMEM instead of capping the limit here.
    vmem_limit = int(min(max(2 * est, 32 * 1024 * 1024), 64 * 1024 * 1024))

    out = pl.pallas_call(
        kern,
        out_shape=jax.ShapeDtypeStruct((N, C_out, L_lane), f32),
        grid=(N,),
        in_specs=[
            pl.BlockSpec((1, C_in, Lp), lambda n: (n, 0, 0)),       # x (per batch)
            pl.BlockSpec((1, C_out, Kp), lambda n: (n, 0, 0)),      # emb coeffs (per batch)
            full((Kp, L_lane)),                                     # emb edge mask
            full((2 * C_out, (K + 1) * C_in)),                      # conv1 + residual weights
            full((C_out, K * C_out)),                               # conv2 weights
            full((C_out, 1)), full((C_out, 1)), full((C_out, 1)),   # b1', b2', bres
        ],
        out_specs=pl.BlockSpec((1, C_out, L_lane), lambda n: (n, 0, 0)),
        scratch_shapes=[pltpu.VMEM(((K + 1) * C_in, L_lane), mm_dtype),   # conv1 slab
                        pltpu.VMEM((K * C_out, L_lane), mm_dtype)],       # conv2 slab
        compiler_params=pltpu.CompilerParams(
            dimension_semantics=("parallel",),        # shards batch over v7x's 2 TCs
            vmem_limit_bytes=vmem_limit),
    )(x_pad, cemb, mask, wbig, w2_cols, col(b1), col(b2), col(params["bres"]))
    return out[:, :, :L]


def ref_forward(x, emb, params, kernel_size, dilation):
    """Pure-JAX reference matching the PyTorch forward (BN in eval mode)."""
    eps = 1e-5
    P = (kernel_size - 1) * dilation // 2

    def conv1d(inp, w, b, d, p):
        y = lax.conv_general_dilated(inp, w, window_strides=(1,), padding=[(p, p)],
                                     rhs_dilation=(d,),
                                     dimension_numbers=("NCH", "OIH", "NCH"))
        return y + b[None, :, None]

    def bn(y, g, bt, m, v):
        return (y - m[None, :, None]) / jnp.sqrt(v[None, :, None] + eps) \
            * g[None, :, None] + bt[None, :, None]

    out = conv1d(x, params["w1"], params["b1"], dilation, P)
    out = jax.nn.relu(bn(out, params["gamma1"], params["beta1"],
                         params["mean1"], params["var1"]))
    emb_rep = jnp.broadcast_to(emb[:, :, None],
                               (emb.shape[0], emb.shape[1], out.shape[-1]))
    cat = jnp.concatenate([out, emb_rep], axis=1)
    out = conv1d(cat, params["w2"], params["b2"], dilation, P)
    out = jax.nn.relu(bn(out, params["gamma2"], params["beta2"],
                         params["mean2"], params["var2"]))
    res = jnp.einsum("oi,nil->nol", params["wres"], x) + params["bres"][None, :, None]
    return out + res


if __name__ == "__main__":
    key = jax.random.PRNGKey(0)
    N, C_in, C_out, E, L = 2, 4, 8, 6, 64
    K, D = 3, 2                                        # config['kernel_size']=3, dilation=2
    ks = jax.random.split(key, 16)

    x = jax.random.normal(ks[0], (N, C_in, L), jnp.float32)
    emb = jax.random.normal(ks[1], (N, E), jnp.float32)

    params = dict(
        w1=0.3 * jax.random.normal(ks[2], (C_out, C_in, K), jnp.float32),
        b1=0.1 * jax.random.normal(ks[3], (C_out,), jnp.float32),
        gamma1=1.0 + 0.1 * jax.random.normal(ks[4], (C_out,), jnp.float32),
        beta1=0.1 * jax.random.normal(ks[5], (C_out,), jnp.float32),
        mean1=0.1 * jax.random.normal(ks[6], (C_out,), jnp.float32),
        var1=1.0 + 0.1 * jax.random.uniform(ks[7], (C_out,), jnp.float32),
        w2=0.3 * jax.random.normal(ks[8], (C_out, C_out + E, K), jnp.float32),
        b2=0.1 * jax.random.normal(ks[9], (C_out,), jnp.float32),
        gamma2=1.0 + 0.1 * jax.random.normal(ks[10], (C_out,), jnp.float32),
        beta2=0.1 * jax.random.normal(ks[11], (C_out,), jnp.float32),
        mean2=0.1 * jax.random.normal(ks[12], (C_out,), jnp.float32),
        var2=1.0 + 0.1 * jax.random.uniform(ks[13], (C_out,), jnp.float32),
        # in_channels != out_channels here -> real 1x1 residual conv
        # (for in_channels == out_channels pass wres=jnp.eye(C), bres=0 -> nn.Identity)
        wres=0.3 * jax.random.normal(ks[14], (C_out, C_in), jnp.float32),
        bres=0.1 * jax.random.normal(ks[15], (C_out,), jnp.float32),
    )

    out = jax.block_until_ready(tcn_block(x, emb, params, kernel_size=K, dilation=D))
    ref = ref_forward(x, emb, params, K, D)

    assert out.shape == (N, C_out, L)
    max_err = float(jnp.max(jnp.abs(out - ref)))
    assert jnp.allclose(out, ref, atol=1e-4, rtol=1e-4), f"max_err={max_err}"
    print("KERNEL_OK")
</pallas_src>

<mosaic_0001>
module attributes {stable_mosaic.version = 11 : i64} {
  func.func @_tcn_kernel(%arg0: i32, %arg1: memref<1x4x132xf32, #tpu.memory_space<vmem>>, %arg2: memref<1x8x8xf32, #tpu.memory_space<vmem>>, %arg3: memref<8x128xf32, #tpu.memory_space<vmem>>, %arg4: memref<16x16xf32, #tpu.memory_space<vmem>>, %arg5: memref<8x24xf32, #tpu.memory_space<vmem>>, %arg6: memref<8x1xf32, #tpu.memory_space<vmem>>, %arg7: memref<8x1xf32, #tpu.memory_space<vmem>>, %arg8: memref<8x1xf32, #tpu.memory_space<vmem>>, %arg9: memref<1x8x128xf32, #tpu.memory_space<vmem>>, %arg10: memref<16x128xf32, #tpu.memory_space<vmem>>, %arg11: memref<24x128xf32, #tpu.memory_space<vmem>>) attributes {dimension_semantics = [#tpu.dimension_semantics<parallel>], iteration_bounds = array<i64: 2>, scalar_prefetch = 0 : i64, scratch_operands = 2 : i64, tpu.core_type = #tpu.core_type<tc>, window_params = [{transform_indices = @transform_0, window_bounds = array<i64: 1, 4, 132>}, {transform_indices = @transform_1, window_bounds = array<i64: 1, 8, 8>}, {pipeline_mode = #tpu.pipeline_mode<synchronous>, transform_indices = @transform_2, window_bounds = array<i64: 8, 128>}, {pipeline_mode = #tpu.pipeline_mode<synchronous>, transform_indices = @transform_3, window_bounds = array<i64: 16, 16>}, {pipeline_mode = #tpu.pipeline_mode<synchronous>, transform_indices = @transform_4, window_bounds = array<i64: 8, 24>}, {pipeline_mode = #tpu.pipeline_mode<synchronous>, transform_indices = @transform_5, window_bounds = array<i64: 8, 1>}, {pipeline_mode = #tpu.pipeline_mode<synchronous>, transform_indices = @transform_6, window_bounds = array<i64: 8, 1>}, {pipeline_mode = #tpu.pipeline_mode<synchronous>, transform_indices = @transform_7, window_bounds = array<i64: 8, 1>}, {transform_indices = @transform_8, window_bounds = array<i64: 1, 8, 128>}]} {
    %c0 = arith.constant 0 : index
    %c0_0 = arith.constant 0 : index
    %c0_1 = arith.constant 0 : index
    %0 = vector.load %arg1[%c0, %c0_0, %c0_1] : memref<1x4x132xf32, #tpu.memory_space<vmem>>, vector<1x4x132xf32>
    %1 = vector.shape_cast %0 : vector<1x4x132xf32> to vector<4x132xf32>
    %2 = vector.extract_strided_slice %1 {offsets = [0, 0], sizes = [4, 128], strides = [1, 1]} : vector<4x132xf32> to vector<4x128xf32>
    %c0_2 = arith.constant 0 : index
    %c0_3 = arith.constant 0 : index
    %3 = vector.load %arg10[%c0_2, %c0_3] : memref<16x128xf32, #tpu.memory_space<vmem>>, vector<4x128xf32>
    tpu.vector_store %arg10[%c0_2, %c0_3], %2 {strides = array<i32>} : memref<16x128xf32, #tpu.memory_space<vmem>>, vector<4x128xf32>,
    %4 = vector.extract_strided_slice %1 {offsets = [0, 2], sizes = [4, 128], strides = [1, 1]} : vector<4x132xf32> to vector<4x128xf32>
    %c4 = arith.constant 4 : index
    %c0_4 = arith.constant 0 : index
    %5 = vector.load %arg10[%c4, %c0_4] : memref<16x128xf32, #tpu.memory_space<vmem>>, vector<4x128xf32>
    tpu.vector_store %arg10[%c4, %c0_4], %4 {strides = array<i32>} : memref<16x128xf32, #tpu.memory_space<vmem>>, vector<4x128xf32>,
    %6 = vector.extract_strided_slice %1 {offsets = [0, 4], sizes = [4, 128], strides = [1, 1]} : vector<4x132xf32> to vector<4x128xf32>
    %c8 = arith.constant 8 : index
    %c0_5 = arith.constant 0 : index
    %7 = vector.load %arg10[%c8, %c0_5] : memref<16x128xf32, #tpu.memory_space<vmem>>, vector<4x128xf32>
    tpu.vector_store %arg10[%c8, %c0_5], %6 {strides = array<i32>} : memref<16x128xf32, #tpu.memory_space<vmem>>, vector<4x128xf32>,
    %8 = vector.extract_strided_slice %1 {offsets = [0, 2], sizes = [4, 128], strides = [1, 1]} : vector<4x132xf32> to vector<4x128xf32>
    %c12 = arith.constant 12 : index
    %c0_6 = arith.constant 0 : index
    %9 = vector.load %arg10[%c12, %c0_6] : memref<16x128xf32, #tpu.memory_space<vmem>>, vector<4x128xf32>
    tpu.vector_store %arg10[%c12, %c0_6], %8 {strides = array<i32>} : memref<16x128xf32, #tpu.memory_space<vmem>>, vector<4x128xf32>,
    %c0_7 = arith.constant 0 : index
    %c0_8 = arith.constant 0 : index
    %10 = vector.load %arg4[%c0_7, %c0_8] : memref<16x16xf32, #tpu.memory_space<vmem>>, vector<16x16xf32>
    %c0_9 = arith.constant 0 : index
    %c0_10 = arith.constant 0 : index
    %11 = vector.load %arg10[%c0_9, %c0_10] : memref<16x128xf32, #tpu.memory_space<vmem>>, vector<16x128xf32>
    %cst = arith.constant dense<0.000000e+00> : vector<16x128xf32>
    %12 = tpu.matmul %10, %11, %cst {dimension_numbers = #tpu.dot_dimension_numbers<[1], [0], [0], [1], [0, 0, 1, 1], [], []>} : vector<16x16xf32>, vector<16x128xf32>, vector<16x128xf32> -> vector<16x128xf32>
    %13 = vector.extract_strided_slice %12 {offsets = [0, 0], sizes = [8, 128], strides = [1, 1]} : vector<16x128xf32> to vector<8x128xf32>
    %c0_11 = arith.constant 0 : index
    %c0_12 = arith.constant 0 : index
    %14 = vector.load %arg6[%c0_11, %c0_12] : memref<8x1xf32, #tpu.memory_space<vmem>>, vector<8x1xf32>
    %15 = vector.broadcast %14 : vector<8x1xf32> to vector<8x128xf32>
    %16 = arith.addf %13, %15 : vector<8x128xf32>
    %cst_13 = arith.constant 0.000000e+00 : f32
    %17 = vector.broadcast %cst_13 : f32 to vector<8x128xf32>
    %18 = arith.maximumf %16, %17 : vector<8x128xf32>
    %19 = vector.extract_strided_slice %12 {offsets = [8, 0], sizes = [8, 128], strides = [1, 1]} : vector<16x128xf32> to vector<8x128xf32>
    %c0_14 = arith.constant 0 : index
    %c0_15 = arith.constant 0 : index
    %20 = vector.load %arg8[%c0_14, %c0_15] : memref<8x1xf32, #tpu.memory_space<vmem>>, vector<8x1xf32>
    %21 = vector.broadcast %20 : vector<8x1xf32> to vector<8x128xf32>
    %22 = arith.addf %19, %21 : vector<8x128xf32>
    %cst_16 = arith.constant 0.000000e+00 : f32
    %23 = vector.broadcast %cst_16 : f32 to vector<8x2xf32>
    %c0_17 = arith.constant 0 : index
    %c0_18 = arith.constant 0 : index
    %24 = vector.load %arg11[%c0_17, %c0_18] : memref<24x128xf32, #tpu.memory_space<vmem>>, vector<8x2xf32>
    tpu.vector_store %arg11[%c0_17, %c0_18], %23 {strides = array<i32>} : memref<24x128xf32, #tpu.memory_space<vmem>>, vector<8x2xf32>,
    %cst_19 = arith.constant 0.000000e+00 : f32
    %25 = vector.broadcast %cst_19 : f32 to vector<8x62xf32>
    %c0_20 = arith.constant 0 : index
    %c66 = arith.constant 66 : index
    %26 = vector.load %arg11[%c0_20, %c66] : memref<24x128xf32, #tpu.memory_space<vmem>>, vector<8x62xf32>
    tpu.vector_store %arg11[%c0_20, %c66], %25 {strides = array<i32>} : memref<24x128xf32, #tpu.memory_space<vmem>>, vector<8x62xf32>,
    %27 = vector.extract_strided_slice %18 {offsets = [0, 0], sizes = [8, 64], strides = [1, 1]} : vector<8x128xf32> to vector<8x64xf32>
    %c0_21 = arith.constant 0 : index
    %c2 = arith.constant 2 : index
    %28 = vector.load %arg11[%c0_21, %c2] : memref<24x128xf32, #tpu.memory_space<vmem>>, vector<8x64xf32>
    tpu.vector_store %arg11[%c0_21, %c2], %27 {strides = array<i32>} : memref<24x128xf32, #tpu.memory_space<vmem>>, vector<8x64xf32>,
    %cst_22 = arith.constant 0.000000e+00 : f32
    %29 = vector.broadcast %cst_22 : f32 to vector<8x64xf32>
    %c8_23 = arith.constant 8 : index
    %c64 = arith.constant 64 : index
    %30 = vector.load %arg11[%c8_23, %c64] : memref<24x128xf32, #tpu.memory_space<vmem>>, vector<8x64xf32>
    tpu.vector_store %arg11[%c8_23, %c64], %29 {strides = array<i32>} : memref<24x128xf32, #tpu.memory_space<vmem>>, vector<8x64xf32>,
    %31 = vector.extract_strided_slice %18 {offsets = [0, 0], sizes = [8, 64], strides = [1, 1]} : vector<8x128xf32> to vector<8x64xf32>
    %c8_24 = arith.constant 8 : index
    %c0_25 = arith.constant 0 : index
    %32 = vector.load %arg11[%c8_24, %c0_25] : memref<24x128xf32, #tpu.memory_space<vmem>>, vector<8x64xf32>
    tpu.vector_store %arg11[%c8_24, %c0_25], %31 {strides = array<i32>} : memref<24x128xf32, #tpu.memory_space<vmem>>, vector<8x64xf32>,
    %cst_26 = arith.constant 0.000000e+00 : f32
    %33 = vector.broadcast %cst_26 : f32 to vector<8x66xf32>
    %c16 = arith.constant 16 : index
    %c62 = arith.constant 62 : index
    %34 = vector.load %arg11[%c16, %c62] : memref<24x128xf32, #tpu.memory_space<vmem>>, vector<8x66xf32>
    tpu.vector_store %arg11[%c16, %c62], %33 {strides = array<i32>} : memref<24x128xf32, #tpu.memory_space<vmem>>, vector<8x66xf32>,
    %35 = vector.extract_strided_slice %18 {offsets = [0, 2], sizes = [8, 62], strides = [1, 1]} : vector<8x128xf32> to vector<8x62xf32>
    %c16_27 = arith.constant 16 : index
    %c0_28 = arith.constant 0 : index
    %36 = vector.load %arg11[%c16_27, %c0_28] : memref<24x128xf32, #tpu.memory_space<vmem>>, vector<8x62xf32>
    tpu.vector_store %arg11[%c16_27, %c0_28], %35 {strides = array<i32>} : memref<24x128xf32, #tpu.memory_space<vmem>>, vector<8x62xf32>,
    %c0_29 = arith.constant 0 : index
    %c0_30 = arith.constant 0 : index
    %37 = vector.load %arg5[%c0_29, %c0_30] : memref<8x24xf32, #tpu.memory_space<vmem>>, vector<8x24xf32>
    %c0_31 = arith.constant 0 : index
    %c0_32 = arith.constant 0 : index
    %38 = vector.load %arg11[%c0_31, %c0_32] : memref<24x128xf32, #tpu.memory_space<vmem>>, vector<24x128xf32>
    %cst_33 = arith.constant dense<0.000000e+00> : vector<8x128xf32>
    %39 = tpu.matmul %37, %38, %cst_33 {dimension_numbers = #tpu.dot_dimension_numbers<[1], [0], [0], [1], [0, 0, 1, 1], [], []>} : vector<8x24xf32>, vector<24x128xf32>, vector<8x128xf32> -> vector<8x128xf32>
    %c0_34 = arith.constant 0 : index
    %c0_35 = arith.constant 0 : index
    %c0_36 = arith.constant 0 : index
    %40 = vector.load %arg2[%c0_34, %c0_35, %c0_36] : memref<1x8x8xf32, #tpu.memory_space<vmem>>, vector<1x8x8xf32>
    %41 = vector.shape_cast %40 : vector<1x8x8xf32> to vector<8x8xf32>
    %c0_37 = arith.constant 0 : index
    %c0_38 = arith.constant 0 : index
    %42 = vector.load %arg3[%c0_37, %c0_38] : memref<8x128xf32, #tpu.memory_space<vmem>>, vector<8x128xf32>
    %cst_39 = arith.constant dense<0.000000e+00> : vector<8x128xf32>
    %43 = tpu.matmul %41, %42, %cst_39 {dimension_numbers = #tpu.dot_dimension_numbers<[1], [0], [0], [1], [0, 0, 1, 1], [], []>} : vector<8x8xf32>, vector<8x128xf32>, vector<8x128xf32> -> vector<8x128xf32>
    %44 = arith.addf %39, %43 : vector<8x128xf32>
    %c0_40 = arith.constant 0 : index
    %c0_41 = arith.constant 0 : index
    %45 = vector.load %arg7[%c0_40, %c0_41] : memref<8x1xf32, #tpu.memory_space<vmem>>, vector<8x1xf32>
    %46 = vector.broadcast %45 : vector<8x1xf32> to vector<8x128xf32>
    %47 = arith.addf %44, %46 : vector<8x128xf32>
    %cst_42 = arith.constant 0.000000e+00 : f32
    %48 = vector.broadcast %cst_42 : f32 to vector<8x128xf32>
    %49 = arith.maximumf %47, %48 : vector<8x128xf32>
    %50 = arith.addf %49, %22 : vector<8x128xf32>
    %c0_43 = arith.constant 0 : index
    %c0_44 = arith.constant 0 : index
    %c0_45 = arith.constant 0 : index
    %51 = vector.load %arg9[%c0_43, %c0_44, %c0_45] : memref<1x8x128xf32, #tpu.memory_space<vmem>>, vector<1x8x128xf32>
    %52 = vector.shape_cast %51 : vector<1x8x128xf32> to vector<8x128xf32>
    %53 = vector.shape_cast %50 : vector<8x128xf32> to vector<1x8x128xf32>
    tpu.vector_store %arg9[%c0_43, %c0_44, %c0_45], %53 {strides = array<i32>} : memref<1x8x128xf32, #tpu.memory_space<vmem>>, vector<1x8x128xf32>,
    return
  }
  func.func @transform_0(%arg0: i32) -> (i32, i32, i32) {
    %c0_i32 = arith.constant 0 : i32
    %c0_i32_0 = arith.constant 0 : i32
    %c0_i32_1 = arith.constant 0 : i32
    return %arg0, %c0_i32, %c0_i32_0 : i32, i32, i32
  }
  func.func @transform_1(%arg0: i32) -> (i32, i32, i32) {
    %c0_i32 = arith.constant 0 : i32
    %c0_i32_0 = arith.constant 0 : i32
    %c0_i32_1 = arith.constant 0 : i32
    return %arg0, %c0_i32, %c0_i32_0 : i32, i32, i32
  }
  func.func @transform_2(%arg0: i32) -> (i32, i32) {
    %c0_i32 = arith.constant 0 : i32
    %c0_i32_0 = arith.constant 0 : i32
    %c0_i32_1 = arith.constant 0 : i32
    return %c0_i32, %c0_i32_0 : i32, i32
  }
  func.func @transform_3(%arg0: i32) -> (i32, i32) {
    %c0_i32 = arith.constant 0 : i32
    %c0_i32_0 = arith.constant 0 : i32
    %c0_i32_1 = arith.constant 0 : i32
    return %c0_i32, %c0_i32_0 : i32, i32
  }
  func.func @transform_4(%arg0: i32) -> (i32, i32) {
    %c0_i32 = arith.constant 0 : i32
    %c0_i32_0 = arith.constant 0 : i32
    %c0_i32_1 = arith.constant 0 : i32
    return %c0_i32, %c0_i32_0 : i32, i32
  }
  func.func @transform_5(%arg0: i32) -> (i32, i32) {
    %c0_i32 = arith.constant 0 : i32
    %c0_i32_0 = arith.constant 0 : i32
    %c0_i32_1 = arith.constant 0 : i32
    return %c0_i32, %c0_i32_0 : i32, i32
  }
  func.func @transform_6(%arg0: i32) -> (i32, i32) {
    %c0_i32 = arith.constant 0 : i32
    %c0_i32_0 = arith.constant 0 : i32
    %c0_i32_1 = arith.constant 0 : i32
    return %c0_i32, %c0_i32_0 : i32, i32
  }
  func.func @transform_7(%arg0: i32) -> (i32, i32) {
    %c0_i32 = arith.constant 0 : i32
    %c0_i32_0 = arith.constant 0 : i32
    %c0_i32_1 = arith.constant 0 : i32
    return %c0_i32, %c0_i32_0 : i32, i32
  }
  func.func @transform_8(%arg0: i32) -> (i32, i32, i32) {
    %c0_i32 = arith.constant 0 : i32
    %c0_i32_0 = arith.constant 0 : i32
    %c0_i32_1 = arith.constant 0 : i32
    return %arg0, %c0_i32, %c0_i32_0 : i32, i32, i32
  }
}

</mosaic_0001>

<bundles_post_ra>
// kernel: tpu_custom_call.1
= control target key start
LH: loop header
LB: loop body
LE: loop exit
PB: predicated region body
PF: predicated region fallthrough
CT: control target
= control target key end

     0   :  { %s1320_s0 = inlined_call_operand.vmem [shape: f32[2,4,132], index: 0, kind: input, shape index: {}]   ;;  %s1321_s1 = inlined_call_operand.hbm [shape: f32[2,8,8], index: 1, kind: input, shape index: {}]   ;;  %s1322_s2 = inlined_call_operand.hbm [shape: f32[8,128], index: 2, kind: input, shape index: {}]   ;;  %s1323_s3 = inlined_call_operand.vmem [shape: f32[16,16], index: 3, kind: input, shape index: {}]   ;;  %s1324_s4 = inlined_call_operand.hbm [shape: f32[8,24], index: 4, kind: input, shape index: {}]   ;;  %s1325_s5 = inlined_call_operand.vmem [shape: f32[8,1], index: 5, kind: input, shape index: {}]   ;;  %s1326_s6 = inlined_call_operand.vmem [shape: f32[8,1], index: 6, kind: input, shape index: {}]   ;;  %s1327_s7 = inlined_call_operand.vmem [shape: f32[8,1], index: 7, kind: input, shape index: {}]   ;;  %s1328_s8 = inlined_call_operand.hbm [shape: f32[2,8,128], index: 8, kind: output, shape index: {}]  }
   0x1   :  { %1333 = sst [smem:[#allocation15_spill]] %s1322_s2 }
   0x2   :  { %1334 = sst [smem:[#allocation16_spill]] %s1324_s4 }
   0x3   :  { %13 = vsyncpa [#allocation5], 0 }
   0x4   :  { %15 = vsyncpa [#allocation5 + $0x1], 0 }
   0x5   :  { %16 = vsyncpa [#allocation8], 0 }
   0x6   :  { %17 = vsyncpa [#allocation6], 0 }
   0x7   :  { %19 = vsyncpa [#allocation6 + $0x1], 0  ;;  %s1123_s27 = smov 0   ;;  %s1125_s28 = smov 0  }
   0x8   :  { %s1127_s29 = smov 0   ;;  %s1129_s30 = smov 0  }
   0x9 LB: > { %s1144_s9 = sadd.s32 4294967295, %s1066_s30   ;;  %s788_s10 = sadd.s32 4294967294, %s1066_s30   ;;  %s1066_s30 = sphi %s1129_s30, %s1356_s30   ;;  %s1062_s29 = sphi %s1127_s29, %s1355_s29   ;;  %s1058_s28 = sphi %s1125_s28, %s1354_s28   ;;  %s1054_s27 = sphi %s1123_s27, %s1353_s27  }
   0xa   : > { %p71_p0 = scmp.ne.s32.totalorder %s1058_s28, %s1054_s27  ;;  %p1329_p1 = scmp.eq.s32.totalorder %s1144_s9, 0 }
   0xb   : > { %p227_p3 = scmp.eq.s32.totalorder %s788_s10, 1  ;;  %p789_p5 = scmp.ge.s32.totalorder %s1066_s30, 1 }
   0xc   : > { %p1153_p4 = por %p1329_p1, %p71_p0  ;;  %p234_p7 = scmp.lt.s32.totalorder %s1066_s30, 3 }
   0xd   : > { %p1158_p6 = por %p227_p3, %p71_p0  ;;  %s1068_s14 = smov [#allocation7]  }
   0xe   : > { %s1335_s11 = scalar_select %p1153_p4, 1, 0 }
   0xf   : > { %s1336_s12 = scalar_select %p1158_p6, 1, 0 }
  0x10   : > { %p1163_p8 = pnand %p789_p5, %p234_p7  ;;  %s247_s15 = sshll.u32 %s1068_s14, 4  ;;  %s248_s15 = int_to_ptr.vmem [resolvable:$true] %s247_s15 }
  0x11   : > { %s1069_s16 = smov [#allocation9]   ;;  %s1177_s19 = sadd.s32 1, %s1066_s30  }
  0x12   : > { %s1337_s13 = scalar_select %p1163_p8, 1, 0 }
  0x13   : > { %p854_p10 = pneg %p1163_p8  ;;  %s261_s17 = sshll.u32 %s1069_s16, 4  ;;  %s262_s17 = int_to_ptr.vmem [resolvable:$true] %s261_s17 }
  0x14   : > { %s55_s20 = ssub.s32 %s1066_s30, %s1177_s19  ;;  %s929_s21 = scalar_lea.vmem %s248_s15, 128 }
  0x15   : > { %p1172_p11 = pnand %p854_p10, %p1329_p1  ;;  %p930_p13 = scmp.ne.s32.totalorder %s248_s15, %s929_s21 }
  0x16   : > { %p937_p5 = scmp.lt.s32.totalorder %s248_s15, %s248_s15  ;;  %p938_p7 = scmp.lt.s32.totalorder %s929_s21, %s929_s21 }
  0x17   : > { %p920_p12 = pneg %p1172_p11 }
  0x18   : > { %p939_p10 = por %p938_p7, %p937_p5 }
  0x19   : > { %p932_p0 = pnand %p930_p13, %p920_p12 }
  0x1b   : > { %p933_p3 = pneg %p932_p0 }
  0x1d   : > { %p940_p9 = pnand %p939_p10, %p933_p3 }
  0x1f   : > { %943 = shalt.err (!%p940_p9)
}
  0x20   : > { %s1339_s2 = sld [smem:[#allocation15_spill]]  ;;  %s955_s24 = scalar_lea.vmem %s262_s17, 128 }
  0x21   : > { %p956_p1 = scmp.ne.s32.totalorder %s262_s17, %s955_s24  ;;  %p963_p13 = scmp.lt.s32.totalorder %s262_s17, %s262_s17 }
  0x22   : > { %p964_p0 = scmp.lt.s32.totalorder %s955_s24, %s955_s24 }
  0x23   : > { %p958_p2 = pnand %p956_p1, %p920_p12 }
  0x24   : > { %p965_p4 = por %p964_p0, %p963_p13 }
  0x25   : > { %p959_p6 = pneg %p958_p2 }
  0x26   : > { %857 = dma.hbm_to_vmem [thread:$0]  (!%p1172_p11), %s1339_s2, 128, %s248_s15, [#allocation8]  }
  0x27   : > { %p966_p8 = pnand %p965_p4, %p959_p6 }
  0x29   : > { %969 = shalt.err (!%p966_p8)
}
  0x2a   : > { %s1340_s4 = sld [smem:[#allocation16_spill]]  ;;  %p56_p1 = scmp.eq.s32.totalorder %s55_s20, 0 }
  0x2b   : > { %s58_s10 = sadd.s32 1, %s1062_s29  ;;  %p65_p2 = scmp.ne.s32.totalorder %s1062_s29, %s1058_s28 }
  0x2c   : > { %p66_p4 = scmp.eq.s32.totalorder %s1066_s30, 0  ;;  %p1342_p8 = scmp.eq.s32.totalorder %s1144_s9, 1 }
  0x2d   : > { %s1204_s14 = scalar_select %p56_p1, %s1062_s29, %s58_s10  }
  0x2e   : > { %p67_p6 = por %p66_p4, %p65_p2  ;;  %p1208_p9 = por %p1342_p8, %p65_p2 }
  0x2f   : > { %1341 = sst [smem:[#allocation14_spill]] %s1204_s14  ;;  %p871_p12 = scmp.lt.s32.totalorder %s1066_s30, 2 }
  0x30   : > { %860 = dma.hbm_to_vmem [thread:$0]  (!%p1172_p11), %s1340_s4, 128, %s262_s17, [#allocation8]  }
  0x31   : > { %s1343_s15 = scalar_select %p1208_p9, 1, 0 }
  0x32   : > { %s289_s16 = sand.u32 1, %s1062_s29   ;;  %s794_s21 = sshll.u32 %s1066_s30, 7 }
  0x33   : > { %s793_s18 = sshll.u32 %s289_s16, 3  ;;  %s1218_s17 = scalar_lea.hbm %s1321_s1, %s794_s21 }
  0x34   : > { %s293_s20 = scalar_lea.vmem [#allocation4], %s793_s18  ;;  %p1220_p11 = pnand %p871_p12, %p67_p6 }
  0x35   : > { %s300_s24 = sshll.u32 %s293_s20, 4  ;;  %s290_s26 = scalar_lea.sflag [#allocation5], %s289_s16  ;;  %s301_s24 = int_to_ptr.vmem [resolvable:$true] %s300_s24 }
  0x36   : > { %s970_s10 = scalar_lea.hbm %s1218_s17, 128  ;;  %p972_p5 = pneg %p1220_p11 }
  0x37   : > { %p971_p3 = scmp.ne.s32.totalorder %s1218_s17, %s970_s10  ;;  %s975_s23 = scalar_lea.hbm %s1321_s1, 256 }
  0x38   : > { %p976_p13 = scmp.lt.s32.totalorder %s1218_s17, %s1321_s1  ;;  %p977_p0 = scmp.lt.s32.totalorder %s975_s23, %s970_s10 }
  0x39   : > { %p973_p7 = pnand %p972_p5, %p971_p3 }
  0x3a   : > { %p978_p1 = por %p977_p0, %p976_p13 }
  0x3b   : > { %p974_p10 = pneg %p973_p7 }
  0x3d   : > { %p979_p2 = pnand %p978_p1, %p974_p10 }
  0x3f   : > { %982 = shalt.err (!%p979_p2)
}
  0x40   : > { %s983_s20 = scalar_lea.vmem %s301_s24, 128  ;;  %s1070_s16 = smov [#allocation4]  }
  0x41   : > { %p984_p4 = scmp.ne.s32.totalorder %s301_s24, %s983_s20  ;;  %s988_s4 = sshll.u32 %s1070_s16, 4  ;;  %s989_s4 = int_to_ptr.vmem [resolvable:$false] %s988_s4 }
  0x42   : > { %s990_s14 = scalar_lea.vmem %s989_s4, 256  ;;  %p991_p12 = scmp.lt.s32.totalorder %s301_s24, %s989_s4 }
  0x43   : > { %p986_p6 = pnand %p984_p4, %p972_p5  ;;  %p992_p3 = scmp.lt.s32.totalorder %s990_s14, %s983_s20 }
  0x45   : > { %p987_p8 = pneg %p986_p6  ;;  %p993_p7 = por %p992_p3, %p991_p12 }
  0x47   : > { %p994_p9 = pnand %p993_p7, %p987_p8 }
  0x49   : > { %997 = shalt.err (!%p994_p9)
}
  0x4a   : > { %864 = dma.hbm_to_vmem [thread:$0]  (!%p1220_p11), %s1218_s17, 128, %s301_s24, %s290_s26  }
  0x4b   : > { %p1345_p10 = scmp.ne.s32.totalorder %s1337_s13, 0 }
  0x4c   : > { %s1241_s2 = sand.u32 (!%p1345_p10), 1, %s1058_s28   ;;  %p1346_p9 = scmp.ne.s32.totalorder (!%p1345_p10), %s1335_s11, 0 }
  0x4d   : > { %309 = sbr.rel (%p1345_p10) target bundleno = 767 (0x2ff), region = 52  ;;  %s796_s10 = sshll.u32 (!%p1345_p10), %s1241_s2, 3 }
  0x4e   : > { %s312_s4 = scalar_lea.sflag (!%p1345_p10), [#allocation5], %s1241_s2  ;;  %s1247_s14 = scalar_lea.vmem (!%p1345_p10), [#allocation4], %s796_s10 }
  0x52   : > { %1041 = dma.done.wait (%p1346_p9), %s312_s4, 128  }
  0x53   : > { %1043 = vsyncadd (%p1346_p9), %s312_s4, 4294967168  ;;  %p1347_p11 = scmp.eq.s32.totalorder %s1144_s9, 0 }
  0x55   : > { %1045 = dma.done.wait (%p1347_p11), [#allocation8], 256   ;;  %p1348_p5 = pmov %p1347_p11 }
  0x56   : > { %p361_p13 = scmp.lt.s32.totalorder %s1144_s9, 1  ;;  %s1071_s21 = smov 124   ;;  %v387_v2 = vld [vmem:[%s1323_s3] sm:$0xff]  ;;  %vm391_vm0 = vcmask 130048   ;;  %v1073_v3 = vmov 0   ;;  %vm382_vm1 = vcmask 1014784  }
  0x57   : > { %1047 = vsyncadd (%p1348_p5), [#allocation8], 4294967040  ;;  %s1072_s11 = smov 126   ;;  %825 = vmatprep.mubr.msk.f32.mxu0 %vm391_vm0, %v387_v2  ;;  %915 = vset.pattern.permute.xlu0 %v1073_v3  ;;  %v473_v4 = vld [vmem:[%s1325_s5] sm:$0xff]  ;;  %vm374_vm2 = vcmask 1031168   ;;  %v388_v14 = vld [vmem:[%s1323_s3 + $0x8] sm:$0xff] }
  0x58   : > { %s362_s13 = scalar_select %p361_p13, %s1144_s9, 1  ;;  %916 = vset.pattern.permute.xlu1 %v1073_v3  ;;  %v663_v5 = vld [vmem:[%s1326_s6] sm:$0xff]  ;;  %vm498_vm3 = vcmask 1048064   ;;  %v1074_v15 = vmov 0.0   ;;  %vm502_vm4 = vcmask 1048048   ;;  %vm488_vm5 = vcmask 15360  }
  0x59   : > { %499 = vst.msk [vmem:[#allocation3 + $0x8] sm:$0xff] %vm498_vm3, %v1074_v15  ;;  %828 = vmatprep.subr.mxu1 %v1074_v15  ;;  %vm490_vm6 = vcmask 1048080   ;;  %v514_v16 = vld [vmem:[#allocation7] sm:$0xff]  ;;  %v513_v17 = vld [vmem:[%s1247_s14] sm:$0xff]  ;;  %vm515_vm7 = vcmask 64512   ;;  %vm1075_vm8 = vmmov 0  }
  0x5a   : > { %s810_s17 = sshll.u32 %s362_s13, 3  ;;  %503 = vst.msk [vmem:[#allocation3 + $0x10] sm:$0xff] %vm502_vm4, %v1074_v15  ;;  %829 = vmatpush3.msra.mxu1 %v514_v16  ;;  %830 = vmatprep.mubr.msk.f32.mxu1 %vm1075_vm8, %v1074_v15  ;;  %vm500_vm9 = vcmask 523264   ;;  %s1076_s24 = smov 2   ;;  %v481_v23 = vld [vmem:[%s1327_s7] sm:$0xff]  ;;  %vm507_vm10 = vcmask 506880  }
  0x5b   : > { %s365_s26 = scalar_lea.vmem %s1320_s0, %s810_s17  ;;  %489 = vst.msk [vmem:[#allocation3] sm:$0xff] %vm488_vm5, %v1074_v15  ;;  %831 = vmatmul.mubr.msk.f32.vlgmr.msra.gmra.mxu1 %vm515_vm7, %v513_v17  ;;  %833 = vmatprep.subr.mxu1 %v1074_v15  ;;  %vm496_vm11 = vcmask 539664   ;;  %v509_v28 = vld [vmem:[#allocation9] sm:$0xff]  ;;  %vm589_vm12 = vcmask 195584   ;;  %s674_s20 = scalar_lea.sflag [#allocation6], %s1241_s2 }
  0x5c   : > { %v366_v0 = vld [vmem:[%s365_s26] sm:$0xff]  ;;  %491 = vst.msk [vmem:[#allocation3] sm:$0xff] %vm490_vm6, %v1074_v15  ;;  %839 = vmatprep.mubr.msk.f32.mxu1 %vm1075_vm8, %v1074_v15  ;;  %s807_s26 = sshll.u32 %s1144_s9, 7  ;;  %p1349_p1 = scmp.ne.s32.totalorder %s1343_s15, 0 }
  0x5d   : > { %378 = vrot.lane.b32.xlu1 %v366_v0, %s1071_s21  ;;  %367 = vst [vmem:[#allocation2] sm:$0xf] %v366_v0  ;;  %370 = vrot.lane.b32.xlu0 %v366_v0, %s1072_s11  ;;  %v369_v1 = vcombine.high %v366_v0, %v366_v0  ;;  %s685_s18 = scalar_lea.hbm %s1328_s8, %s807_s26  ;;  %s1077_s4 = smov [#allocation10]  }
  0x5e   : > { %s1002_s9 = sshll.u32 %s1077_s4, 4  ;;  %s1003_s9 = int_to_ptr.vmem [resolvable:$false] %s1002_s9 }
  0x61   : > { %380 = vrot.lane.b32.xlu1 %v369_v1, %s1071_s21  ;;  %372 = vrot.lane.b32.xlu0 %v369_v1, %s1072_s11  ;;  %s360_s21 = scalar_lea.vmem [#allocation10], %s796_s10  ;;  %s1004_s10 = scalar_lea.vmem %s1003_s9, 256 }
  0x65   : > { %476 = vperm.xlu0 %915, %v473_v4  }
  0x69   : > { %666 = vperm.xlu0 %915, %v663_v5  }
  0xcf   : > { %v379_v6 = vpop.permute.xlu1 %378  ;;  %v371_v7 = vpop.permute.xlu0 %370 }
  0xd3   : > { %v381_v8 = vpop.permute.xlu1 %380  ;;  %v373_v9 = vpop.permute.xlu0 %372 }
  0xd4   : > { %v383_v10 = vsel %vm382_vm1, %v379_v6, %v381_v8  ;;  %v375_v11 = vsel %vm374_vm2, %v371_v7, %v373_v9 }
  0xd5   : > { %385 = vst [vmem:[#allocation2 + $0x8] sm:$0xf] %v383_v10  ;;  %377 = vst [vmem:[#allocation2 + $0x4] sm:$0xf] %v375_v11 }
  0xd6   : > { %386 = vst [vmem:[#allocation2 + $0xc] sm:$0xf] %v375_v11 }
  0xdc   : > { %v389_v13 = vld [vmem:[#allocation2] sm:$0xff] }
  0xdd   : > { %v390_v12 = vld [vmem:[#allocation2 + $0x8] sm:$0xff] }
  0xde   : > { %821 = vmatprep.subr.mxu0 %v390_v12 }
  0xdf   : > { %822 = vmatpush3.msra.mxu0 %v390_v12 }
  0xe0   : > { %823 = vmatprep.subr.mxu0 %v389_v13  ;;  %v477_v19 = vpop.permute.xlu0 %476 }
  0xe1   : > { %824 = vmatpush3.msra.mxu0 %v389_v13 }
  0xe2   : > { %826 = vmatmul.mubr.msk.f32.vlgmr.msra.gmra.mxu0 %vm391_vm0, %v388_v14 }
  0xe4   : > { %v667_v33 = vpop.permute.xlu0 %666 }
 0x11b   : > { %v585_v30 = vpop.f32.mrf.mxu1 }
 0x11d   : > { %v832_v31 = vpop.f32.mrf.mxu1 }
 0x1a2   : > { %v827_v18 = vpop.f32.mrf.mxu0 }
 0x1a4   : > { %v464_v20 = vpop.f32.mrf.mxu0 }
 0x1a5   : > { %v479_v21 = vadd.f32 %v477_v19, %v464_v20 }
 0x1a7   : > { %v480_v22 = vmax.f32 %v479_v21, 0.0 }
 0x1a9   : > { %501 = vst.msk [vmem:[#allocation3 + $0x8] sm:$0xff] %vm500_vm9, %v480_v22  ;;  %504 = vrot.lane.b32.xlu1 %v480_v22, %s1072_s11  ;;  %s687_s11 = sshll.u32 %s360_s21, 4  ;;  %s688_s11 = int_to_ptr.vmem [resolvable:$true] %s687_s11 }
 0x1aa   : > { %s998_s16 = scalar_lea.vmem %s688_s11, 128  ;;  %p1005_p6 = scmp.lt.s32.totalorder %s688_s11, %s1003_s9 }
 0x1ab   : > { %p999_p0 = scmp.ne.s32.totalorder %s688_s11, %s998_s16  ;;  %p1006_p8 = scmp.lt.s32.totalorder %s1004_s10, %s998_s16 }
 0x1ad   : > { %493 = vrot.lane.b32.xlu1 %v480_v22, %s1076_s24  ;;  %p1000_p2 = pnand %p999_p0, %p1349_p1  ;;  %p1007_p12 = por %p1006_p8, %p1005_p6 }
 0x1af   : > { %p1001_p4 = pneg %p1000_p2 }
 0x1b0   : > { %v511_v27 = vld [vmem:[#allocation3 + $0x8] sm:$0xff] }
 0x1b1   : > { %484 = vperm.xlu1 %916, %v481_v23   ;;  %p1008_p3 = pnand %p1007_p12, %p1001_p4 }
 0x21b   : > { %v505_v24 = vpop.permute.xlu1 %504 }
 0x21c   : > { %508 = vst.msk [vmem:[#allocation3 + $0x10] sm:$0xff] %vm507_vm10, %v505_v24 }
 0x21f   : > { %v494_v25 = vpop.permute.xlu1 %493 }
 0x220   : > { %497 = vst.msk [vmem:[#allocation3] sm:$0xff] %vm496_vm11, %v494_v25 }
 0x223   : > { %v512_v26 = vld [vmem:[#allocation3 + $0x10] sm:$0xff] }
 0x224   : > { %834 = vmatpush3.msra.mxu1 %v512_v26 }
 0x225   : > { %835 = vmatprep.subr.mxu1 %v1074_v15 }
 0x226   : > { %836 = vmatpush3.msra.mxu1 %v511_v27 }
 0x227   : > { %837 = vmatprep.subr.mxu1 %v1074_v15  ;;  %v510_v29 = vld [vmem:[#allocation3] sm:$0xff] }
 0x228   : > { %838 = vmatpush3.msra.mxu1 %v510_v29 }
 0x229   : > { %840 = vmatmul.mubr.msk.f32.vlgmr.msra.gmra.mxu1 %vm589_vm12, %v509_v28 }
 0x22c   : > { %v485_v35 = vpop.permute.xlu1 %484 }
 0x22d   : > { %v487_v38 = vadd.f32 %v827_v18, %v485_v35 }
 0x2e9   : > { %v659_v32 = vpop.f32.mrf.mxu1 }
 0x2ea   : > { %v660_v34 = vadd.f32 %v659_v32, %v585_v30 }
 0x2eb   : > { %v841_v36 = vpop.f32.mrf.mxu1 }
 0x2ec   : > { %v669_v37 = vadd.f32 %v667_v33, %v660_v34 }
 0x2ee   : > { %v670_v39 = vmax.f32 %v669_v37, 0.0 }
 0x2f0   : > { %v671_v40 = vadd.f32 %v670_v39, %v487_v38 }
 0x2f2   : > { %672 = vst [vmem:[%s360_s21] sm:$0xff] %v671_v40 }
 0x2f3   : > { %1011 = shalt.err (!%p1008_p3)
}
 0x2f4   : > { %s1012_s13 = scalar_lea.hbm %s685_s18, 128  ;;  %s1016_s24 = scalar_lea.hbm %s1328_s8, 256 }
 0x2f5   : > { %p1013_p7 = scmp.ne.s32.totalorder %s685_s18, %s1012_s13  ;;  %p1017_p11 = scmp.lt.s32.totalorder %s685_s18, %s1328_s8 }
 0x2f6   : > { %p1018_p5 = scmp.lt.s32.totalorder %s1016_s24, %s1012_s13 }
 0x2f7   : > { %p1014_p10 = pnand %p1013_p7, %p1349_p1 }
 0x2f8   : > { %p1019_p13 = por %p1018_p5, %p1017_p11 }
 0x2f9   : > { %p1015_p9 = pneg %p1014_p10 }
 0x2fb   : > { %p1020_p0 = pnand %p1019_p13, %p1015_p9 }
 0x2fd   : > { %1023 = shalt.err (!%p1020_p0)
}
 0x2fe   : > { %852 = dma.vmem_to_hbm [thread:$0]  (%p1349_p1), %s688_s11, 128, %s685_s18, %s674_s20  }
 0x2ff PF: > { %s699_s26 = sand.u32 1, %s1054_s27   ;;  %p1350_p2 = scmp.ne.s32.totalorder %s1336_s12, 0 }
 0x300   : > { %p1351_p4 = scmp.ge.s32.totalorder %s1066_s30, 2  ;;  %s700_s21 = scalar_lea.sflag [#allocation6], %s699_s26 }
 0x302   : > { %p866_p6 = pnand %p1351_p4, %p1350_p2 }
 0x304   : > { %p867_p8 = pneg %p866_p6 }
 0x306   : > { %1049 = dma.done.wait (%p867_p8), %s700_s21, 128  }
 0x307   : > { %1051 = vsyncadd (%p867_p8), %s700_s21, 4294967168  ;;  %s1352_s22 = sld [smem:[#allocation14_spill]]  ;;  %p22_p12 = scmp.ge.s32.totalorder %s1177_s19, 4  }
 0x308   : > { %s1353_s27 = smov %s1058_s28  ;;  %s1354_s28 = smov %s1062_s29 }
 0x309   : > { %s1356_s30 = smov %s1177_s19  ;;  %24 = sbr.rel (!%p22_p12) target bundleno = 9 (0x9), region = 108 }
 0x30d   : > { %s1355_s29 = smov %s1352_s22 }
 0x30e   :  { %705 = vsyncpa [#allocation5], 1 }
 0x30f   :  { %707 = vsyncpa [#allocation5 + $0x1], 1 }
 0x310   :  { %708 = vsyncpa [#allocation8], 1 }
 0x311   :  { %709 = vsyncpa [#allocation6], 1 }
 0x312   :  { %711 = vsyncpa [#allocation6 + $0x1], 1 }

</bundles_post_ra>
